<compile_context>
chip_gen: v6e
topology: v6e:2x2x1
jax: 0.10.0
libtpu: 0.0.40
codegen_flags: <defaults>
</compile_context>

<pallas_src>
import functools

import jax
import jax.numpy as jnp
from jax.experimental import pallas as pl
from jax.experimental.pallas import tpu as pltpu


_TARGET_TILE_BYTES = 4 << 20      # ~4 MiB of input per grid step
_VMEM_LIMIT_BYTES = 32 << 20      # safe on v5e/v6e (128 MiB) and v7x (64 MiB)


# --------------------------------------------------------------------------
# 2-D path: (rows, dim), normalized axis on lanes, per-row XLU lane reduce.
# --------------------------------------------------------------------------
def _pixel_norm_rows_kernel(x_ref, o_ref, *, inv_dim, eps):
    xf = x_ref[...].astype(jnp.float32)
    ss = jnp.sum(xf * xf, axis=-1, keepdims=True)        # XLU cross-lane reduce
    inv = jax.lax.rsqrt(ss * inv_dim + eps)               # EUP rsqrt
    # Re-load (instead of reusing xf) so bf16 tiles don't keep an f32 copy live.
    o_ref[...] = (x_ref[...].astype(jnp.float32) * inv).astype(o_ref.dtype)


def _choose_tm(n_rows, dim, itemsize):
    mult = 16 if itemsize < 4 else 8                       # sublane packing
    row_bytes = max(1, dim * itemsize)
    tm = max(mult, (_TARGET_TILE_BYTES // row_bytes) // mult * mult)
    # Keep >= 2 grid steps for v7x megacore when the batch is big enough.
    if n_rows > 2 * mult:
        half = ((pl.cdiv(n_rows, 2) + mult - 1) // mult) * mult
        tm = min(tm, half)
    if tm >= n_rows:
        return n_rows                                      # single full block
    return tm


def _pixel_norm_rows(x, *, eps=1e-8, tm=None):
    """Row-wise PixelNorm on a 2-D array (rows, dim); dim sits on lanes."""
    N, dim = x.shape
    if tm is None:
        tm = _choose_tm(N, dim, x.dtype.itemsize)

    grid = (pl.cdiv(N, tm),)
    kernel = functools.partial(_pixel_norm_rows_kernel, inv_dim=1.0 / dim, eps=eps)

    cost = pl.CostEstimate(
        flops=3 * N * dim,                                 # square + reduce + scale
        transcendentals=N,                                 # one rsqrt per row
        bytes_accessed=2 * N * dim * x.dtype.itemsize,
    )

    return pl.pallas_call(
        kernel,
        out_shape=jax.ShapeDtypeStruct((N, dim), x.dtype),
        grid=grid,
        in_specs=[pl.BlockSpec((tm, dim), lambda i: (i, 0))],
        out_specs=pl.BlockSpec((tm, dim), lambda i: (i, 0)),
        compiler_params=pltpu.CompilerParams(
            dimension_semantics=("parallel",),
            vmem_limit_bytes=_VMEM_LIMIT_BYTES,
        ),
        cost_estimate=cost,
    )(x)


# --------------------------------------------------------------------------
# Generic-rank path: (B, C, *spatial) normalized over C.  Reshape (no
# transpose!) to (B, C, HW); block (1, C, tile_hw); sublane reduce over C.
# --------------------------------------------------------------------------
def _pixel_norm_chan_kernel(x_ref, o_ref, *, inv_c, eps):
    xf = x_ref[...].astype(jnp.float32)                    # (1, C, thw)
    ss = jnp.sum(xf * xf, axis=-2, keepdims=True)          # sublane reduce -> (1,1,thw)
    inv = jax.lax.rsqrt(ss * inv_c + eps)
    o_ref[...] = (x_ref[...].astype(jnp.float32) * inv).astype(o_ref.dtype)


def _choose_thw(hw, c, itemsize):
    col_bytes = max(1, c * itemsize)
    thw = max(128, (_TARGET_TILE_BYTES // col_bytes) // 128 * 128)
    if thw >= hw:
        return hw                                          # single full block along HW
    return thw


def _pixel_norm_channels(x, *, eps=1e-8):
    B, C = x.shape[0], x.shape[1]
    HW = 1
    for s in x.shape[2:]:
        HW *= s
    x3 = x.reshape((B, C, HW))                             # layout no-op for NCHW

    thw = _choose_thw(HW, C, x.dtype.itemsize)
    grid = (B, pl.cdiv(HW, thw))
    kernel = functools.partial(_pixel_norm_chan_kernel, inv_c=1.0 / C, eps=eps)

    total = B * C * HW
    cost = pl.CostEstimate(
        flops=3 * total,
        transcendentals=B * HW,
        bytes_accessed=2 * total * x.dtype.itemsize,
    )

    out = pl.pallas_call(
        kernel,
        out_shape=jax.ShapeDtypeStruct((B, C, HW), x.dtype),
        grid=grid,
        in_specs=[pl.BlockSpec((1, C, thw), lambda b, j: (b, 0, j))],
        out_specs=pl.BlockSpec((1, C, thw), lambda b, j: (b, 0, j)),
        compiler_params=pltpu.CompilerParams(
            dimension_semantics=("parallel", "parallel"),
            vmem_limit_bytes=_VMEM_LIMIT_BYTES,
        ),
        cost_estimate=cost,
    )(x3)
    return out.reshape(x.shape)


def pixel_norm(x, *, eps=1e-8, tm=None):
    """PixelNorm.forward: x * rsqrt(mean(x**2, dim=1, keepdim=True) + eps).

    2-D latents (N, dim) use the lane-reduce kernel; higher-rank inputs
    (normalized over axis 1, like the PyTorch module) use the transpose-free
    sublane-reduce kernel with the spatial product on the lane axis.
    """
    if x.ndim == 2:
        return _pixel_norm_rows(x, eps=eps, tm=tm)
    return _pixel_norm_channels(x, eps=eps)


def _reference(x, eps=1e-8):
    xf = x.astype(jnp.float32)
    out = xf * jax.lax.rsqrt(jnp.mean(xf * xf, axis=1, keepdims=True) + eps)
    return out.astype(x.dtype)


if __name__ == "__main__":
    key = jax.random.PRNGKey(0)
    k1, k2, k3 = jax.random.split(key, 3)

    # 1) StyleGAN2 primary usage: PixelNorm on latent vectors (batch, latent_dim).
    x2 = jax.random.normal(k1, (16, 256), dtype=jnp.float32)
    out2 = jax.block_until_ready(pixel_norm(x2))
    assert jnp.allclose(out2, _reference(x2), atol=1e-5, rtol=1e-5)

    # 2) Multi-step grid with a partial final row block.
    x2b = jax.random.normal(k2, (40, 256), dtype=jnp.float32)
    out2b = jax.block_until_ready(pixel_norm(x2b))
    assert jnp.allclose(out2b, _reference(x2b), atol=1e-5, rtol=1e-5)

    # 3) Generic dim=1 normalization on a small 4-D feature map (module semantics),
    #    exercising the transpose-free sublane-reduce path.
    x4 = jax.random.normal(k3, (2, 4, 16, 16), dtype=jnp.float32)
    out4 = jax.block_until_ready(pixel_norm(x4))
    assert jnp.allclose(out4, _reference(x4), atol=1e-5, rtol=1e-5)

    print("KERNEL_OK")
</pallas_src>

<mosaic_0001>
module attributes {stable_mosaic.version = 11 : i64} {
  func.func @_pixel_norm_rows_kernel(%arg0: i32, %arg1: memref<16x256xf32, #tpu.memory_space<vmem>>, %arg2: memref<16x256xf32, #tpu.memory_space<vmem>>) attributes {dimension_semantics = [#tpu.dimension_semantics<parallel>], iteration_bounds = array<i64: 1>, scalar_prefetch = 0 : i64, scratch_operands = 0 : i64, tpu.core_type = #tpu.core_type<tc>, window_params = [{transform_indices = @transform_0, window_bounds = array<i64: 16, 256>}, {transform_indices = @transform_1, window_bounds = array<i64: 16, 256>}]} {
    %c0 = arith.constant 0 : index
    %c0_0 = arith.constant 0 : index
    %0 = vector.load %arg1[%c0, %c0_0] : memref<16x256xf32, #tpu.memory_space<vmem>>, vector<16x256xf32>
    %1 = arith.mulf %0, %0 : vector<16x256xf32>
    %cst = arith.constant dense<0.000000e+00> : vector<16xf32>
    %2 = vector.multi_reduction <add>, %1, %cst [1] : vector<16x256xf32> to vector<16xf32>
    %3 = vector.shape_cast %2 : vector<16xf32> to vector<16x1xf32>
    %cst_1 = arith.constant 3.906250e-03 : f32
    %4 = vector.broadcast %cst_1 : f32 to vector<16x1xf32>
    %5 = arith.mulf %3, %4 : vector<16x1xf32>
    %cst_2 = arith.constant 9.99999993E-9 : f32
    %6 = vector.broadcast %cst_2 : f32 to vector<16x1xf32>
    %7 = arith.addf %5, %6 : vector<16x1xf32>
    %8 = math.rsqrt %7 : vector<16x1xf32>
    %c0_3 = arith.constant 0 : index
    %c0_4 = arith.constant 0 : index
    %9 = vector.load %arg1[%c0_3, %c0_4] : memref<16x256xf32, #tpu.memory_space<vmem>>, vector<16x256xf32>
    %10 = vector.broadcast %8 : vector<16x1xf32> to vector<16x256xf32>
    %11 = arith.mulf %9, %10 : vector<16x256xf32>
    %c0_5 = arith.constant 0 : index
    %c0_6 = arith.constant 0 : index
    %12 = vector.load %arg2[%c0_5, %c0_6] : memref<16x256xf32, #tpu.memory_space<vmem>>, vector<16x256xf32>
    tpu.vector_store %arg2[%c0_5, %c0_6], %11 {strides = array<i32>} : memref<16x256xf32, #tpu.memory_space<vmem>>, vector<16x256xf32>,
    return
  }
  func.func @transform_0(%arg0: i32) -> (i32, i32) {
    %c0_i32 = arith.constant 0 : i32
    %c0_i32_0 = arith.constant 0 : i32
    return %arg0, %c0_i32 : i32, i32
  }
  func.func @transform_1(%arg0: i32) -> (i32, i32) {
    %c0_i32 = arith.constant 0 : i32
    %c0_i32_0 = arith.constant 0 : i32
    return %arg0, %c0_i32 : i32, i32
  }
}

</mosaic_0001>

<bundles_post_ra>
// kernel: tpu_custom_call.1
= control target key start
LH: loop header
LB: loop body
LE: loop exit
PB: predicated region body
PF: predicated region fallthrough
CT: control target
= control target key end

     0   :  { %6 = vsyncpa [#allocation3], 0  ;;  %s146_s0 = inlined_call_operand.hbm [shape: f32[16,256], index: 0, kind: input, shape index: {}]   ;;  %s147_s1 = inlined_call_operand.hbm [shape: f32[16,256], index: 1, kind: output, shape index: {}]  }
   0x1   :  { %7 = vsyncpa [#allocation4], 0  ;;  %s120_s6 = smov [#allocation2]  }
   0x2   :  { %s13_s7 = sshll.u32 %s120_s6, 4  ;;  %s14_s7 = int_to_ptr.vmem [resolvable:$true] %s13_s7 }
   0x3   :  { %s84_s8 = scalar_lea.vmem %s14_s7, 512  ;;  %p89_p1 = scmp.lt.s32.totalorder %s14_s7, %s14_s7 }
   0x4   :  { %p85_p0 = scmp.ne.s32.totalorder %s14_s7, %s84_s8  ;;  %p90_p2 = scmp.lt.s32.totalorder %s84_s8, %s84_s8 }
   0x6   :  { %p91_p3 = por %p90_p2, %p89_p1 }
   0x8   :  { %p92_p4 = pnand %p91_p3, %p85_p0 }
   0xa   :  { %95 = shalt.err (!%p92_p4)
}
   0xb   :  { %s121_s9 = smov 256   ;;  %s122_s10 = smov 16  }
   0xc   :  { %19 = dma.hbm_to_vmem [thread:$0]  %s146_s0, 512, %s14_s7, [#allocation3], %s121_s9, %s121_s9, %s122_s10  }
   0xd   :  { %116 = dma.done.wait [#allocation3], 512  }
   0xe   :  { %117 = vsyncadd [#allocation3], 4294966784  ;;  %v23_v0 = vld [vmem:[#allocation2] sm:$0xff]  ;;  %v24_v1 = vld [vmem:[#allocation2 + $0x8] sm:$0xff]  ;;  %s123_s0 = smov [#allocation5]  }
   0xf   :  { %v25_v2 = vld [vmem:[#allocation2 + $0x10] sm:$0xff]  ;;  %v27_v3 = vmul.f32 %v23_v0, %v23_v0  ;;  %v28_v4 = vmul.f32 %v24_v1, %v24_v1  ;;  %v26_v5 = vld [vmem:[#allocation2 + $0x18] sm:$0xff]  ;;  %s56_s13 = sshll.u32 %s123_s0, 4  ;;  %s57_s13 = int_to_ptr.vmem [resolvable:$true] %s56_s13 }
  0x10   :  { %v29_v6 = vmul.f32 %v25_v2, %v25_v2  ;;  %v30_v7 = vmul.f32 %v26_v5, %v26_v5  ;;  %s96_s14 = scalar_lea.vmem %s57_s13, 512  ;;  %p101_p6 = scmp.lt.s32.totalorder %s57_s13, %s57_s13 }
  0x11   :  { %v31_v8 = vadd.f32 %v28_v4, %v27_v3  ;;  %p97_p5 = scmp.ne.s32.totalorder %s57_s13, %s96_s14  ;;  %p102_p7 = scmp.lt.s32.totalorder %s96_s14, %s96_s14 }
  0x12   :  { %v34_v9 = vadd.f32 %v30_v7, %v29_v6 }
  0x13   :  { %32 = vadd.xlane.f32.xlu0 %v31_v8  ;;  %p103_p8 = por %p102_p7, %p101_p6 }
  0x15   :  { %p104_p9 = pnand %p103_p8, %p97_p5 }
  0x17   :  { %35 = vadd.xlane.f32.xlu0 %v34_v9 }
  0x9c   :  { %v33_v10 = vpop.xlane.xlu0 %32 }
  0x9d   :  { %v37_v11 = vmul.f32 0.00390625, %v33_v10 }
  0x9f   :  { %v39_v12 = vadd.f32 1e-08, %v37_v11 }
  0xa0   :  { %v36_v13 = vpop.xlane.xlu0 %35 }
  0xa1   :  { %72 = vrsqrt.f32 %v39_v12  ;;  %v38_v14 = vmul.f32 0.00390625, %v36_v13 }
  0xa3   :  { %v40_v15 = vadd.f32 1e-08, %v38_v14 }
  0xa5   :  { %74 = vrsqrt.f32 %v40_v15 }
  0xae   :  { %v73_v16 = vpop.eup %72 }
  0xaf   :  { %v43_v17 = vmul.f32 %v73_v16, %v23_v0  ;;  %v44_v18 = vmul.f32 %v73_v16, %v24_v1 }
  0xb1   :  { %47 = vst [vmem:[#allocation5] sm:$0xff] %v43_v17  ;;  %48 = vst [vmem:[#allocation5 + $0x8] sm:$0xff] %v44_v18 }
  0xb2   :  { %v75_v19 = vpop.eup %74 }
  0xb3   :  { %v45_v20 = vmul.f32 %v75_v19, %v25_v2  ;;  %v46_v21 = vmul.f32 %v75_v19, %v26_v5 }
  0xb5   :  { %49 = vst [vmem:[#allocation5 + $0x10] sm:$0xff] %v45_v20  ;;  %50 = vst [vmem:[#allocation5 + $0x18] sm:$0xff] %v46_v21 }
  0xb6   :  { %107 = shalt.err (!%p104_p9)
}
  0xb7   :  { %62 = dma.vmem_to_hbm [thread:$0]  %s57_s13, 512, %s147_s1, [#allocation4], %s121_s9, %s121_s9, %s122_s10  }
  0xb8   :  { %118 = dma.done.wait [#allocation4], 512  }
  0xb9   :  { %119 = vsyncadd [#allocation4], 4294966784 }
  0xba   :  { %66 = vsyncpa [#allocation3], 1 }
  0xbb   :  { %67 = vsyncpa [#allocation4], 1 }

</bundles_post_ra>
